<compile_context>
chip_gen: v7x
topology: tpu7x:2x2x1
jax: 0.10.0
libtpu: 0.0.40
codegen_flags: <defaults>
</compile_context>

<pallas_src>
import jax
import jax.numpy as jnp
from jax.experimental import pallas as pl
from jax.experimental.pallas import tpu as pltpu

SUB = 8      # sublanes
LANE = 128   # lanes


def _mlp_kernel(x_ref, w1_ref, b1_ref, w2_ref, b2_ref, w3_ref, b3_ref, o_ref):
    # x_ref: SMEM (3,) f32
    # w1_ref/w2_ref/w3_ref: VMEM (8,128) f32; b1_ref/b3_ref: (1,128); b2_ref: (8,1)
    x0 = x_ref[0]
    x1 = x_ref[1]
    x2 = x_ref[2]

    # fc1 + relu: three scalar-broadcast FMAs on the VPU, outputs in lanes 0..2.
    h1 = (x0 * w1_ref[0:1, :]
          + x1 * w1_ref[1:2, :]
          + x2 * w1_ref[2:3, :]
          + b1_ref[...])
    h1 = jnp.maximum(h1, 0.0)                                   # (1, 128)

    # fc2 + relu: contract over lanes, outputs land in sublanes 0..2.
    h2 = jnp.sum(jnp.broadcast_to(h1, (SUB, LANE)) * w2_ref[...],
                 axis=1, keepdims=True) + b2_ref[...]
    h2 = jnp.maximum(h2, 0.0)                                   # (8, 1)

    # fc3 + sigmoid: contract over sublanes, scalar result lands in lane 0.
    h3 = jnp.sum(jnp.broadcast_to(h2, (SUB, LANE)) * w3_ref[...],
                 axis=0, keepdims=True) + b3_ref[...]           # (1, 128)

    lane = jax.lax.broadcasted_iota(jnp.int32, (1, LANE), 1)
    o_ref[...] = jnp.where(lane == 0, jax.nn.sigmoid(h3), 0.0)  # zero padded lanes


def _pad2d(a, rows, cols):
    a = jnp.asarray(a, jnp.float32)
    return jnp.zeros((rows, cols), jnp.float32).at[: a.shape[0], : a.shape[1]].set(a)


def prepare_params(params):
    """One-time packing of PyTorch-layout params into TPU-friendly tiles.

    Call once, reuse the result for every forward call.
    """
    w1, b1, w2, b2, w3, b3 = params
    w1t = _pad2d(w1.T, SUB, LANE)        # in (3) along sublanes, out (3) along lanes
    b1r = _pad2d(b1[None, :], 1, LANE)   # (1, 128)
    w2p = _pad2d(w2, SUB, LANE)          # out (3) along sublanes, in (3) along lanes
    b2c = _pad2d(b2[:, None], SUB, 1)    # (8, 1)
    w3t = _pad2d(w3.T, SUB, LANE)        # in (3) along sublanes, out (1) in lane 0
    b3r = _pad2d(b3[None, :], 1, LANE)   # (1, 128)
    return (w1t, b1r, w2p, b2c, w3t, b3r)


_SMEM = pl.BlockSpec(memory_space=pltpu.MemorySpace.SMEM)
_VMEM = pl.BlockSpec(memory_space=pltpu.MemorySpace.VMEM)


@jax.jit
def ensemble_mlp_forward(x1, x2, x3, prepared):
    """Returns a jnp array of shape (1,), matching the PyTorch output shape."""
    w1t, b1r, w2p, b2c, w3t, b3r = prepared
    x = jnp.stack([x1, x2, x3]).astype(jnp.float32)             # (3,) scalars -> SMEM
    out = pl.pallas_call(
        _mlp_kernel,
        out_shape=jax.ShapeDtypeStruct((1, LANE), jnp.float32),
        in_specs=[_SMEM, _VMEM, _VMEM, _VMEM, _VMEM, _VMEM, _VMEM],
        out_specs=_VMEM,
    )(x, w1t, b1r, w2p, b2c, w3t, b3r)
    return out[0, 0:1]                                          # (1,)


def init_params(key):
    """Deterministic init mimicking nn.Linear's uniform(-1/sqrt(fan_in), ...)."""
    ks = jax.random.split(key, 6)

    def lin(kw, kb, fan_in, fan_out):
        bound = 1.0 / jnp.sqrt(fan_in)
        w = jax.random.uniform(kw, (fan_out, fan_in), jnp.float32, -bound, bound)
        b = jax.random.uniform(kb, (fan_out,), jnp.float32, -bound, bound)
        return w, b

    w1, b1 = lin(ks[0], ks[1], 3, 3)
    w2, b2 = lin(ks[2], ks[3], 3, 3)
    w3, b3 = lin(ks[4], ks[5], 3, 1)
    return (w1, b1, w2, b2, w3, b3)


def reference_forward(x1, x2, x3, params):
    w1, b1, w2, b2, w3, b3 = params
    x = jnp.stack([x1, x2, x3]).astype(jnp.float32)
    x = jnp.maximum(x @ w1.T + b1, 0.0)
    x = jnp.maximum(x @ w2.T + b2, 0.0)
    x = x @ w3.T + b3
    return jax.nn.sigmoid(x)


if __name__ == "__main__":
    key = jax.random.PRNGKey(0)
    pkey, xkey = jax.random.split(key)
    params = init_params(pkey)
    prepared = prepare_params(params)          # one-time padding, hoisted off call path

    xs = jax.random.normal(xkey, (3,), jnp.float32)
    x1, x2, x3 = xs[0], xs[1], xs[2]

    out = ensemble_mlp_forward(x1, x2, x3, prepared)
    out = jax.block_until_ready(out)

    ref = reference_forward(x1, x2, x3, params)
    assert out.shape == (1,)
    assert jnp.allclose(out, ref, atol=1e-5, rtol=1e-5), (out, ref)

    print("KERNEL_OK")
</pallas_src>

<mosaic_0001>
module attributes {stable_mosaic.version = 11 : i64} {
  func.func @_mlp_kernel(%arg0: memref<3xf32, #tpu.memory_space<smem>>, %arg1: memref<8x128xf32, #tpu.memory_space<vmem>>, %arg2: memref<1x128xf32, #tpu.memory_space<vmem>>, %arg3: memref<8x128xf32, #tpu.memory_space<vmem>>, %arg4: memref<8x1xf32, #tpu.memory_space<vmem>>, %arg5: memref<8x128xf32, #tpu.memory_space<vmem>>, %arg6: memref<1x128xf32, #tpu.memory_space<vmem>>, %arg7: memref<1x128xf32, #tpu.memory_space<vmem>>) attributes {dimension_semantics = [], scalar_prefetch = 0 : i64, scratch_operands = 0 : i64, tpu.core_type = #tpu.core_type<tc>} {
    %c0 = arith.constant 0 : index
    %0 = memref.load %arg0[%c0] : memref<3xf32, #tpu.memory_space<smem>>
    %c1 = arith.constant 1 : index
    %1 = memref.load %arg0[%c1] : memref<3xf32, #tpu.memory_space<smem>>
    %c2 = arith.constant 2 : index
    %2 = memref.load %arg0[%c2] : memref<3xf32, #tpu.memory_space<smem>>
    %c0_0 = arith.constant 0 : index
    %c0_1 = arith.constant 0 : index
    %3 = vector.load %arg1[%c0_0, %c0_1] : memref<8x128xf32, #tpu.memory_space<vmem>>, vector<1x128xf32>
    %4 = vector.broadcast %0 : f32 to vector<1x128xf32>
    %5 = arith.mulf %4, %3 : vector<1x128xf32>
    %c1_2 = arith.constant 1 : index
    %c0_3 = arith.constant 0 : index
    %6 = vector.load %arg1[%c1_2, %c0_3] : memref<8x128xf32, #tpu.memory_space<vmem>>, vector<1x128xf32>
    %7 = vector.broadcast %1 : f32 to vector<1x128xf32>
    %8 = arith.mulf %7, %6 : vector<1x128xf32>
    %9 = arith.addf %5, %8 : vector<1x128xf32>
    %c2_4 = arith.constant 2 : index
    %c0_5 = arith.constant 0 : index
    %10 = vector.load %arg1[%c2_4, %c0_5] : memref<8x128xf32, #tpu.memory_space<vmem>>, vector<1x128xf32>
    %11 = vector.broadcast %2 : f32 to vector<1x128xf32>
    %12 = arith.mulf %11, %10 : vector<1x128xf32>
    %13 = arith.addf %9, %12 : vector<1x128xf32>
    %c0_6 = arith.constant 0 : index
    %c0_7 = arith.constant 0 : index
    %14 = vector.load %arg2[%c0_6, %c0_7] : memref<1x128xf32, #tpu.memory_space<vmem>>, vector<1x128xf32>
    %15 = arith.addf %13, %14 : vector<1x128xf32>
    %cst = arith.constant 0.000000e+00 : f32
    %16 = vector.broadcast %cst : f32 to vector<1x128xf32>
    %17 = arith.maximumf %15, %16 : vector<1x128xf32>
    %18 = vector.shape_cast %17 : vector<1x128xf32> to vector<1x128xf32>
    %19 = vector.broadcast %18 : vector<1x128xf32> to vector<8x128xf32>
    %c0_8 = arith.constant 0 : index
    %c0_9 = arith.constant 0 : index
    %20 = vector.load %arg3[%c0_8, %c0_9] : memref<8x128xf32, #tpu.memory_space<vmem>>, vector<8x128xf32>
    %21 = arith.mulf %19, %20 : vector<8x128xf32>
    %cst_10 = arith.constant dense<0.000000e+00> : vector<8xf32>
    %22 = vector.multi_reduction <add>, %21, %cst_10 [1] : vector<8x128xf32> to vector<8xf32>
    %23 = vector.shape_cast %22 : vector<8xf32> to vector<8x1xf32>
    %c0_11 = arith.constant 0 : index
    %c0_12 = arith.constant 0 : index
    %24 = vector.load %arg4[%c0_11, %c0_12] : memref<8x1xf32, #tpu.memory_space<vmem>>, vector<8x1xf32>
    %25 = arith.addf %23, %24 : vector<8x1xf32>
    %cst_13 = arith.constant 0.000000e+00 : f32
    %26 = vector.broadcast %cst_13 : f32 to vector<8x1xf32>
    %27 = arith.maximumf %25, %26 : vector<8x1xf32>
    %28 = vector.shape_cast %27 : vector<8x1xf32> to vector<8x1xf32>
    %29 = vector.broadcast %28 : vector<8x1xf32> to vector<8x128xf32>
    %c0_14 = arith.constant 0 : index
    %c0_15 = arith.constant 0 : index
    %30 = vector.load %arg5[%c0_14, %c0_15] : memref<8x128xf32, #tpu.memory_space<vmem>>, vector<8x128xf32>
    %31 = arith.mulf %29, %30 : vector<8x128xf32>
    %cst_16 = arith.constant dense<0.000000e+00> : vector<128xf32>
    %32 = vector.multi_reduction <add>, %31, %cst_16 [0] : vector<8x128xf32> to vector<128xf32>
    %33 = vector.shape_cast %32 : vector<128xf32> to vector<1x128xf32>
    %c0_17 = arith.constant 0 : index
    %c0_18 = arith.constant 0 : index
    %34 = vector.load %arg6[%c0_17, %c0_18] : memref<1x128xf32, #tpu.memory_space<vmem>>, vector<1x128xf32>
    %35 = arith.addf %33, %34 : vector<1x128xf32>
    %36 = tpu.iota {dimensions = array<i32: 1>} : vector<1x128xi32>
    %c0_i32 = arith.constant 0 : i32
    %37 = vector.broadcast %c0_i32 : i32 to vector<1x128xi32>
    %38 = arith.cmpi eq, %36, %37 : vector<1x128xi32>
    %39 = arith.negf %35 : vector<1x128xf32>
    %40 = math.exp %39 : vector<1x128xf32>
    %cst_19 = arith.constant 1.000000e+00 : f32
    %41 = vector.broadcast %cst_19 : f32 to vector<1x128xf32>
    %42 = arith.addf %41, %40 : vector<1x128xf32>
    %43 = arith.divf %41, %42 : vector<1x128xf32>
    %cst_20 = arith.constant 0.000000e+00 : f32
    %44 = vector.broadcast %cst_20 : f32 to vector<1x128xf32>
    %45 = arith.select %38, %43, %44 : vector<1x128xi1>, vector<1x128xf32>
    %c0_21 = arith.constant 0 : index
    %c0_22 = arith.constant 0 : index
    %46 = vector.load %arg7[%c0_21, %c0_22] : memref<1x128xf32, #tpu.memory_space<vmem>>, vector<1x128xf32>
    tpu.vector_store %arg7[%c0_21, %c0_22], %45 {strides = array<i32>} : memref<1x128xf32, #tpu.memory_space<vmem>>, vector<1x128xf32>,
    return
  }
}

</mosaic_0001>

<bundles_post_ra>
// kernel: ensemble_mlp_forward.1
= control target key start
LH: loop header
LB: loop body
LE: loop exit
PB: predicated region body
PF: predicated region fallthrough
CT: control target
= control target key end

     0   :  { %12 = vsyncpa [#allocation4], 0  ;;  %s240_s0 = inlined_call_operand.vmem [shape: f32[3], index: 0, kind: input, shape index: {}]   ;;  %s241_s1 = inlined_call_operand.vmem [shape: f32[8,128], index: 1, kind: input, shape index: {}]   ;;  %s242_s2 = inlined_call_operand.vmem [shape: f32[1,128], index: 2, kind: input, shape index: {}]   ;;  %s243_s3 = inlined_call_operand.vmem [shape: f32[8,128], index: 3, kind: input, shape index: {}]   ;;  %s244_s4 = inlined_call_operand.vmem [shape: f32[8,1], index: 4, kind: input, shape index: {}]   ;;  %s245_s5 = inlined_call_operand.vmem [shape: f32[8,128], index: 5, kind: input, shape index: {}]   ;;  %s246_s6 = inlined_call_operand.vmem [shape: f32[1,128], index: 6, kind: input, shape index: {}]   ;;  %s247_s7 = inlined_call_operand.hbm [shape: f32[1,128], index: 7, kind: output, shape index: {}]  }
   0x1   :  { %13 = vsyncpa [#allocation3], 0  ;;  %s20_s26 = sshll.u32 %s240_s0, 4  ;;  %s21_s26 = int_to_ptr.vmem [resolvable:$true] %s20_s26 }
   0x2   :  { %s120_s27 = scalar_lea.vmem %s21_s26, 16  ;;  %p125_p1 = scmp.lt.s32.totalorder %s21_s26, %s21_s26 }
   0x3   :  { %p121_p0 = scmp.ne.s32.totalorder %s21_s26, %s120_s27  ;;  %p126_p2 = scmp.lt.s32.totalorder %s120_s27, %s120_s27 }
   0x5   :  { %p127_p3 = por %p126_p2, %p125_p1 }
   0x7   :  { %p128_p4 = pnand %p127_p3, %p121_p0 }
   0x9   :  { %131 = shalt.err (!%p128_p4)
}
   0xa   :  { %s158_s28 = smov [#allocation2]  }
   0xb   :  { %23 = dma.vmem_to_smem %s21_s26, 16, %s158_s28, [#allocation4]  }
   0xc   :  { %154 = dma.done.wait [#allocation4], 16  }
   0xd   :  { %155 = vsyncadd [#allocation4], 4294967280 }
   0xe   :  { %39 = sfence }
   0xf   :  { %s40_s29 = sld [smem:[#allocation2]]  ;;  %s109_s30 = sld [smem:[#allocation2 + $0x1]]  ;;  %v43_v0 = vld [vmem:[%s241_s1] sm:$0x1]  ;;  %v46_v1 = vld [vmem:[%s241_s1 + $0x1] sm:$0x1]  ;;  %v57_v3 = vlaneseq }
  0x10   :  { %s110_s8 = sld [smem:[#allocation2 + $0x2]]  ;;  %v50_v2 = vld [vmem:[%s241_s1 + $0x2] sm:$0x1]  ;;  %v54_v12 = vld [vmem:[%s242_s2] sm:$0x1]  ;;  %v159_v20 = vmov 0  }
  0x11   :  { %v58_v11 = vshrl.u32 %v57_v3, 7  ;;  %v61_v17 = vld [vmem:[%s243_s3] sm:$0xff]  ;;  %115 = vset.pattern.permute.xlu0 %v159_v20  ;;  %v84_v39 = vand.u32 127, %v57_v3 }
  0x12   :  { %v65_v21 = vld [vmem:[%s244_s4] sm:$0xff]  ;;  %s160_s4 = smov [#allocation5]  }
  0x13   :  { %v59_v15 = vsub.s32 0, %v58_v11  ;;  %v73_v25 = vld [vmem:[%s245_s5] sm:$0xff]  ;;  %s100_s5 = sshll.u32 %s160_s4, 4  ;;  %vm85_vm0 = vcmp.eq.s32.totalorder %v84_v39, 0  ;;  %s101_s5 = int_to_ptr.vmem [resolvable:$true] %s100_s5 }
  0x14   :  { %v81_v33 = vld [vmem:[%s246_s6] sm:$0x1]  ;;  %s132_s21 = scalar_lea.vmem %s101_s5, 16  ;;  %s136_s22 = scalar_lea.vmem %s101_s5, 32 }
  0x15   :  { %v44_v4 = vstv %s40_s29  ;;  %v47_v5 = vstv %s109_s30  ;;  %p133_p5 = scmp.ne.s32.totalorder %s101_s5, %s132_s21  ;;  %p137_p6 = scmp.lt.s32.totalorder %s101_s5, %s101_s5 }
  0x16   :  { %v45_v6 = vmul.f32 %v44_v4, %v43_v0  ;;  %v48_v7 = vmul.f32 %v47_v5, %v46_v1  ;;  %v51_v8 = vstv %s110_s8  ;;  %p138_p7 = scmp.lt.s32.totalorder %s136_s22, %s132_s21 }
  0x17   :  { %v52_v9 = vmul.f32 %v51_v8, %v50_v2 }
  0x18   :  { %v49_v10 = vadd.f32 %v48_v7, %v45_v6  ;;  %p139_p8 = por %p138_p7, %p137_p6 }
  0x1a   :  { %v53_v13 = vadd.f32 %v52_v9, %v49_v10  ;;  %p140_p9 = pnand %p139_p8, %p133_p5 }
  0x1c   :  { %v55_v14 = vadd.f32 %v54_v12, %v53_v13 }
  0x1e   :  { %v56_v16 = vmax.f32 %v55_v14, 0.0 }
  0x20   :  { %v60_v18 = vrot.slane %v56_v16, %v59_v15 }
  0x22   :  { %v62_v19 = vmul.f32 %v61_v17, %v60_v18 }
  0x24   :  { %63 = vadd.xlane.f32.xlu0 %v62_v19 }
  0xb1   :  { %v64_v22 = vpop.xlane.xlu0 %63 }
  0xb2   :  { %v66_v23 = vadd.f32 %v65_v21, %v64_v22 }
  0xb4   :  { %v67_v24 = vmax.f32 %v66_v23, 0.0 }
  0xb6   :  { %70 = vperm.xlu0 %115, %v67_v24  }
 0x135   :  { %v71_v26 = vpop.permute.xlu0 %70 }
 0x136   :  { %v74_v27 = vmul.f32 %v73_v25, %v71_v26 }
 0x138   :  { %v75_v28 = vrot.slane %v74_v27, 4 }
 0x13a   :  { %v76_v29 = vadd.f32 %v75_v28, %v74_v27 }
 0x13c   :  { %v77_v30 = vrot.slane %v76_v29, 2 }
 0x13e   :  { %v78_v31 = vadd.f32 %v77_v30, %v76_v29 }
 0x140   :  { %v79_v32 = vrot.slane %v78_v31, 1 }
 0x142   :  { %v80_v34 = vadd.f32 %v79_v32, %v78_v31 }
 0x144   :  { %v82_v35 = vadd.f32 %v81_v33, %v80_v34 }
 0x146   :  { %v111_v36 = vmul.f32 -1.442695, %v82_v35 }
 0x148   :  { %116 = vpow2.f32 %v111_v36 }
 0x152   :  { %v117_v37 = vpop.eup %116 }
 0x153   :  { %v89_v38 = vadd.f32 1.0, %v117_v37 }
 0x155   :  { %118 = vrcp.f32 %v89_v38 }
 0x15f   :  { %v119_v40 = vpop.eup %118 }
 0x160   :  { %v92_v41 = vsel %vm85_vm0, %v119_v40, 0.0 }
 0x161   :  { %93 = vst [vmem:[#allocation5] sm:$0x1] %v92_v41 }
 0x162   :  { %143 = shalt.err (!%p140_p9)
}
 0x163   :  { %s144_s24 = scalar_lea.hbm %s247_s7, 16 }
 0x164   :  { %p145_p10 = scmp.ne.s32.totalorder %s247_s7, %s144_s24  ;;  %p148_p11 = scmp.lt.u32.totalorder %s144_s24, %s247_s7 }
 0x166   :  { %p150_p12 = pnand %p148_p11, %p145_p10 }
 0x168   :  { %153 = shalt.err (!%p150_p12)
}
 0x169   :  { %103 = dma.vmem_to_hbm [thread:$0]  %s101_s5, 16, %s247_s7, [#allocation3]  }
 0x16a   :  { %156 = dma.done.wait [#allocation3], 16  }
 0x16b   :  { %157 = vsyncadd [#allocation3], 4294967280 }
 0x16c   :  { %107 = vsyncpa [#allocation3], 1 }
 0x16d   :  { %108 = vsyncpa [#allocation4], 1 }

</bundles_post_ra>
